<compile_context>
chip_gen: v7x
topology: tpu7x:2x2x1
jax: 0.10.0
libtpu: 0.0.40
codegen_flags: <defaults>
</compile_context>

<pallas_src>
import functools

import numpy as np

import jax
import jax.numpy as jnp
from jax.experimental import pallas as pl
from jax.experimental.pallas import tpu as pltpu

SIM_COEFF = 25.0
STD_COEFF = 25.0
COV_COEFF = 1.0

_VMEM_LIMIT = 40 * 1024 * 1024      # sized against v7x (64 MiB physical VMEM)
_STATS_BLOCK_ELEMS = 1 << 20        # ~4 MiB f32 per streamed (RB, Dp) block


def _round_up(x, m):
    return ((x + m - 1) // m) * m


def _pow2_floor(x):
    return 1 << (max(int(x), 1).bit_length() - 1)


# ---------------------------------------------------------------------------
# Pass 1: row normalization + per-column statistics.
# ---------------------------------------------------------------------------
def _stats_kernel(t_ref, s_ref, x_ref, y_ref, stats_ref,
                  sx, sy, qx, qy, d2):
    i = pl.program_id(1)

    @pl.when(i == 0)
    def _():
        sx[...] = jnp.zeros_like(sx)
        sy[...] = jnp.zeros_like(sy)
        qx[...] = jnp.zeros_like(qx)
        qy[...] = jnp.zeros_like(qy)
        d2[...] = jnp.zeros_like(d2)
        stats_ref[...] = jnp.zeros_like(stats_ref)

    t = t_ref[...].astype(jnp.float32)
    s = s_ref[...].astype(jnp.float32)

    # F.normalize(v, dim=1, eps=1e-12) == v * rsqrt(max(||v||^2, eps^2)).
    eps2 = 1e-24
    x = t * jax.lax.rsqrt(jnp.maximum(jnp.sum(t * t, axis=1, keepdims=True), eps2))
    y = s * jax.lax.rsqrt(jnp.maximum(jnp.sum(s * s, axis=1, keepdims=True), eps2))

    # Normalized features for the covariance pass (bf16 optional).
    x_ref[...] = x.astype(x_ref.dtype)
    y_ref[...] = y.astype(y_ref.dtype)

    d = x - y
    sx[...] += jnp.sum(x, axis=0, keepdims=True)          # column sums
    sy[...] += jnp.sum(y, axis=0, keepdims=True)
    qx[...] += jnp.sum(x * x, axis=0, keepdims=True)      # column sums of squares
    qy[...] += jnp.sum(y * y, axis=0, keepdims=True)
    d2[...] += jnp.sum(d * d, axis=0, keepdims=True)      # per-column MSE sums

    @pl.when(i == pl.num_programs(1) - 1)
    def _():
        stats_ref[0:1, :] = sx[...]
        stats_ref[1:2, :] = sy[...]
        stats_ref[2:3, :] = qx[...]
        stats_ref[3:4, :] = qy[...]
        stats_ref[4:5, :] = d2[...]


# ---------------------------------------------------------------------------
# Pass 2: upper-triangular tiled covariance squared-sum (Gram + rank-1 fix).
# ---------------------------------------------------------------------------
def _cov_kernel(ii_ref, jj_ref,
                xi_ref, xj_ref, yi_ref, yj_ref,
                mxc_ref, mxr_ref, myc_ref, myr_ref,
                out_ref, acc_x, acc_y, *, batch):
    p = pl.program_id(0)
    k = pl.program_id(1)

    @pl.when(k == 0)
    def _():
        acc_x[...] = jnp.zeros_like(acc_x)
        acc_y[...] = jnp.zeros_like(acc_y)
        out_ref[...] = jnp.zeros_like(out_ref)

    # Raw Gram of the normalized features; the batch chunk is the MXU
    # contraction axis.  Zero-padded batch rows contribute exactly 0.
    dn = (((0,), (0,)), ((), ()))
    acc_x[...] += jax.lax.dot_general(xi_ref[...], xj_ref[...], dn,
                                      preferred_element_type=jnp.float32)
    acc_y[...] += jax.lax.dot_general(yi_ref[...], yj_ref[...], dn,
                                      preferred_element_type=jnp.float32)

    @pl.when(k == pl.num_programs(1) - 1)
    def _():
        # Rank-1 mean correction, applied once per tile pair in f32:
        #   (X - 1 m)^T (X - 1 m) = X^T X - B * m_i^T m_j.
        b = jnp.float32(batch)
        cx = acc_x[...] - b * (mxc_ref[...] * mxr_ref[...])
        cy = acc_y[...] - b * (myc_ref[...] * myr_ref[...])
        inv_bm1 = 1.0 / (batch - 1)
        # Off-diagonal tile pairs are counted twice (cov symmetry); 1/(B-1)^2
        # applied once here instead of two full-tile multiplies.
        w = jnp.where(ii_ref[p] == jj_ref[p], 1.0, 2.0) * (inv_bm1 * inv_bm1)
        val = (jnp.sum(cx * cx) + jnp.sum(cy * cy)) * w
        lane = jax.lax.broadcasted_iota(jnp.int32, (1, 128), 1)
        out_ref[...] = jnp.where(lane == 0, val, 0.0)


# ---------------------------------------------------------------------------
# Wrapper
# ---------------------------------------------------------------------------
@functools.partial(jax.jit, static_argnames=("cov_dtype",))
def vicreg_loss(teacher_feature, student_feature, *, cov_dtype=jnp.float32):
    # cov_dtype=jnp.bfloat16 halves normalized-feature traffic and runs the
    # Gram at the bf16 MXU rate (f32 accumulation kept); f32 default matches
    # the PyTorch reference exactly.
    assert teacher_feature.shape == student_feature.shape
    assert teacher_feature.ndim == 2
    B, D = teacher_feature.shape
    assert B >= 2, "VICReg variance/covariance require batch_size >= 2"

    # ---- static tiling plan -------------------------------------------------
    Dp = _round_up(D, 128)                       # lane-dense feature axis
    if Dp % 512 == 0:
        td = 512
    elif Dp % 256 == 0:
        td = 256
    else:
        td = 128
    n_d = Dp // td

    rb_cap = max(8, min(1024, _pow2_floor(_STATS_BLOCK_ELEMS // Dp)))
    B8 = _round_up(B, 8)
    if B8 <= rb_cap:
        # Single batch tile: no core split, single contraction chunk.
        RB, C = B8, 1
        B_pad = B8
        kb = B_pad
    else:
        # Multi-tile: pad the batch to an even number of row tiles so the
        # stats pass can be split across both TensorCores on v7x.  Halve RB
        # until the zero-row padding stays below ~12.5% of the batch.
        RB = rb_cap
        while RB > 8 and (_round_up(B8, 2 * RB) - B8) * 8 > B8:
            RB //= 2
        C = 2
        B_pad = _round_up(B8, 2 * RB)
        kb = 512                                  # cov-pass contraction chunk
        while B_pad % kb:
            kb //= 2
    nb = B_pad // RB
    nbc = nb // C
    n_k = B_pad // kb

    t = teacher_feature
    s = student_feature
    if (B_pad != B) or (Dp != D):
        t = jnp.pad(t, ((0, B_pad - B), (0, Dp - D)))
        s = jnp.pad(s, ((0, B_pad - B), (0, Dp - D)))

    # ---- pass 1: normalize + column statistics ------------------------------
    row_map = lambda c, i: (c * nbc + i, 0)
    x_n, y_n, stats = pl.pallas_call(
        _stats_kernel,
        grid=(C, nbc),
        in_specs=[pl.BlockSpec((RB, Dp), row_map),
                  pl.BlockSpec((RB, Dp), row_map)],
        out_specs=[pl.BlockSpec((RB, Dp), row_map),
                   pl.BlockSpec((RB, Dp), row_map),
                   pl.BlockSpec((8, Dp), lambda c, i: (c, 0))],
        out_shape=[jax.ShapeDtypeStruct((B_pad, Dp), cov_dtype),
                   jax.ShapeDtypeStruct((B_pad, Dp), cov_dtype),
                   jax.ShapeDtypeStruct((C * 8, Dp), jnp.float32)],
        scratch_shapes=[pltpu.VMEM((1, Dp), jnp.float32)] * 5,
        compiler_params=pltpu.CompilerParams(
            dimension_semantics=("parallel", "arbitrary"),
            vmem_limit_bytes=_VMEM_LIMIT),
    )(t, s)

    # ---- tiny epilogue on (Dp,)-vectors -------------------------------------
    stats = stats.reshape(C, 8, Dp)
    colsum_x = jnp.sum(stats[:, 0, :], axis=0)
    colsum_y = jnp.sum(stats[:, 1, :], axis=0)
    colsq_x = jnp.sum(stats[:, 2, :], axis=0)
    colsq_y = jnp.sum(stats[:, 3, :], axis=0)
    sse = jnp.sum(stats[:, 4, :])

    inv_b = 1.0 / B
    inv_bm1 = 1.0 / (B - 1)
    mean_x = colsum_x * inv_b
    mean_y = colsum_y * inv_b
    var_x = (colsq_x - B * mean_x * mean_x) * inv_bm1      # == diag(cov_x)
    var_y = (colsq_y - B * mean_y * mean_y) * inv_bm1

    valid = (jnp.arange(Dp) < D).astype(jnp.float32)       # mask padded features
    std_x = jnp.sqrt(var_x + 1e-4)
    std_y = jnp.sqrt(var_y + 1e-4)
    std_loss = 0.5 * jnp.sum((jnp.maximum(1.0 - std_x, 0.0)
                              + jnp.maximum(1.0 - std_y, 0.0)) * valid) / D
    diag_sq = jnp.sum((var_x * var_x + var_y * var_y) * valid)
    repr_loss = sse / (B * D)

    # ---- pass 2: upper-triangular covariance squared-sum --------------------
    iu, ju = np.triu_indices(n_d)
    ii = jnp.asarray(iu.astype(np.int32))
    jj = jnp.asarray(ju.astype(np.int32))
    n_pairs = int(iu.shape[0])

    mxr = mean_x.reshape(1, Dp)
    myr = mean_y.reshape(1, Dp)
    mxc = mean_x.reshape(Dp, 1)
    myc = mean_y.reshape(Dp, 1)

    cov = functools.partial(_cov_kernel, batch=B)
    partials = pl.pallas_call(
        cov,
        grid_spec=pltpu.PrefetchScalarGridSpec(
            num_scalar_prefetch=2,
            grid=(n_pairs, n_k),
            in_specs=[
                pl.BlockSpec((kb, td), lambda p, k, ii, jj: (k, ii[p])),
                pl.BlockSpec((kb, td), lambda p, k, ii, jj: (k, jj[p])),
                pl.BlockSpec((kb, td), lambda p, k, ii, jj: (k, ii[p])),
                pl.BlockSpec((kb, td), lambda p, k, ii, jj: (k, jj[p])),
                pl.BlockSpec((td, 1), lambda p, k, ii, jj: (ii[p], 0)),
                pl.BlockSpec((1, td), lambda p, k, ii, jj: (0, jj[p])),
                pl.BlockSpec((td, 1), lambda p, k, ii, jj: (ii[p], 0)),
                pl.BlockSpec((1, td), lambda p, k, ii, jj: (0, jj[p])),
            ],
            out_specs=pl.BlockSpec((1, 128), lambda p, k, ii, jj: (0, p)),
            scratch_shapes=[pltpu.VMEM((td, td), jnp.float32),
                            pltpu.VMEM((td, td), jnp.float32)]),
        out_shape=jax.ShapeDtypeStruct((1, n_pairs * 128), jnp.float32),
        compiler_params=pltpu.CompilerParams(
            dimension_semantics=("parallel", "arbitrary"),
            vmem_limit_bytes=_VMEM_LIMIT),
    )(ii, jj, x_n, x_n, y_n, y_n, mxc, mxr, myc, myr)

    total_sq = jnp.sum(partials)                 # sum over all cov entries^2
    cov_loss = (total_sq - diag_sq) / D          # remove diagonal -> off-diag only

    return SIM_COEFF * repr_loss + STD_COEFF * std_loss + COV_COEFF * cov_loss


def vicreg_loss_ref(t, s):
    """Pure-JAX reference mirroring the PyTorch forward."""
    B, D = t.shape
    eps = 1e-12
    x = t / jnp.maximum(jnp.linalg.norm(t, axis=1, keepdims=True), eps)
    y = s / jnp.maximum(jnp.linalg.norm(s, axis=1, keepdims=True), eps)
    repr_loss = jnp.mean((x - y) ** 2)
    x = x - x.mean(axis=0)
    y = y - y.mean(axis=0)
    std_x = jnp.sqrt(jnp.var(x, axis=0, ddof=1) + 1e-4)
    std_y = jnp.sqrt(jnp.var(y, axis=0, ddof=1) + 1e-4)
    std_loss = (jnp.mean(jax.nn.relu(1 - std_x)) / 2
                + jnp.mean(jax.nn.relu(1 - std_y)) / 2)
    cov_x = x.T @ x / (B - 1)
    cov_y = y.T @ y / (B - 1)
    off = 1.0 - jnp.eye(D)
    cov_loss = (jnp.sum((cov_x * off) ** 2) + jnp.sum((cov_y * off) ** 2)) / D
    return SIM_COEFF * repr_loss + STD_COEFF * std_loss + COV_COEFF * cov_loss


if __name__ == "__main__":
    key = jax.random.PRNGKey(0)
    k1, k2, k3, k4 = jax.random.split(key, 4)

    # Small shape matching the module (batch, num_features).
    B, D = 8, 32
    teacher = jax.random.normal(k1, (B, D), dtype=jnp.float32)
    student = jax.random.normal(k2, (B, D), dtype=jnp.float32)
    loss = jax.block_until_ready(vicreg_loss(teacher, student))
    ref = jax.block_until_ready(vicreg_loss_ref(teacher, student))
    assert jnp.allclose(loss, ref, rtol=1e-3, atol=1e-3), (float(loss), float(ref))

    # Second check exercising batch padding, the 2-chunk stats split, the
    # multi-chunk contraction and the triangular multi-tile covariance path.
    B2, D2 = 1100, 384
    teacher2 = jax.random.normal(k3, (B2, D2), dtype=jnp.float32)
    student2 = jax.random.normal(k4, (B2, D2), dtype=jnp.float32)
    loss2 = jax.block_until_ready(vicreg_loss(teacher2, student2))
    ref2 = jax.block_until_ready(vicreg_loss_ref(teacher2, student2))
    assert jnp.allclose(loss2, ref2, rtol=1e-3, atol=1e-3), (float(loss2), float(ref2))

    print("KERNEL_OK")
</pallas_src>

<mosaic_0001>
module attributes {stable_mosaic.version = 11 : i64} {
  func.func @_stats_kernel(%arg0: i32, %arg1: i32, %arg2: memref<8x128xf32, #tpu.memory_space<vmem>>, %arg3: memref<8x128xf32, #tpu.memory_space<vmem>>, %arg4: memref<8x128xf32, #tpu.memory_space<vmem>>, %arg5: memref<8x128xf32, #tpu.memory_space<vmem>>, %arg6: memref<8x128xf32, #tpu.memory_space<vmem>>, %arg7: memref<1x128xf32, #tpu.memory_space<vmem>>, %arg8: memref<1x128xf32, #tpu.memory_space<vmem>>, %arg9: memref<1x128xf32, #tpu.memory_space<vmem>>, %arg10: memref<1x128xf32, #tpu.memory_space<vmem>>, %arg11: memref<1x128xf32, #tpu.memory_space<vmem>>) attributes {dimension_semantics = [#tpu.dimension_semantics<parallel>, #tpu.dimension_semantics<arbitrary>], iteration_bounds = array<i64: 1, 1>, scalar_prefetch = 0 : i64, scratch_operands = 5 : i64, tpu.core_type = #tpu.core_type<tc>, window_params = [{transform_indices = @transform_0, window_bounds = array<i64: 8, 128>}, {transform_indices = @transform_1, window_bounds = array<i64: 8, 128>}, {transform_indices = @transform_2, window_bounds = array<i64: 8, 128>}, {transform_indices = @transform_3, window_bounds = array<i64: 8, 128>}, {transform_indices = @transform_4, window_bounds = array<i64: 8, 128>}]} {
    %c0_i32 = arith.constant 0 : i32
    %0 = arith.cmpi eq, %arg1, %c0_i32 : i32
    %1 = arith.extui %0 : i1 to i32
    %c0_i32_0 = arith.constant 0 : i32
    %2 = arith.cmpi ne, %1, %c0_i32_0 : i32
    scf.if %2 {
      %cst_38 = arith.constant 0.000000e+00 : f32
      %55 = vector.broadcast %cst_38 : f32 to vector<1x128xf32>
      %c0_39 = arith.constant 0 : index
      %c0_40 = arith.constant 0 : index
      %56 = vector.load %arg7[%c0_39, %c0_40] : memref<1x128xf32, #tpu.memory_space<vmem>>, vector<1x128xf32>
      tpu.vector_store %arg7[%c0_39, %c0_40], %55 {strides = array<i32>} : memref<1x128xf32, #tpu.memory_space<vmem>>, vector<1x128xf32>,
      %cst_41 = arith.constant 0.000000e+00 : f32
      %57 = vector.broadcast %cst_41 : f32 to vector<1x128xf32>
      %c0_42 = arith.constant 0 : index
      %c0_43 = arith.constant 0 : index
      %58 = vector.load %arg8[%c0_42, %c0_43] : memref<1x128xf32, #tpu.memory_space<vmem>>, vector<1x128xf32>
      tpu.vector_store %arg8[%c0_42, %c0_43], %57 {strides = array<i32>} : memref<1x128xf32, #tpu.memory_space<vmem>>, vector<1x128xf32>,
      %cst_44 = arith.constant 0.000000e+00 : f32
      %59 = vector.broadcast %cst_44 : f32 to vector<1x128xf32>
      %c0_45 = arith.constant 0 : index
      %c0_46 = arith.constant 0 : index
      %60 = vector.load %arg9[%c0_45, %c0_46] : memref<1x128xf32, #tpu.memory_space<vmem>>, vector<1x128xf32>
      tpu.vector_store %arg9[%c0_45, %c0_46], %59 {strides = array<i32>} : memref<1x128xf32, #tpu.memory_space<vmem>>, vector<1x128xf32>,
      %cst_47 = arith.constant 0.000000e+00 : f32
      %61 = vector.broadcast %cst_47 : f32 to vector<1x128xf32>
      %c0_48 = arith.constant 0 : index
      %c0_49 = arith.constant 0 : index
      %62 = vector.load %arg10[%c0_48, %c0_49] : memref<1x128xf32, #tpu.memory_space<vmem>>, vector<1x128xf32>
      tpu.vector_store %arg10[%c0_48, %c0_49], %61 {strides = array<i32>} : memref<1x128xf32, #tpu.memory_space<vmem>>, vector<1x128xf32>,
      %cst_50 = arith.constant 0.000000e+00 : f32
      %63 = vector.broadcast %cst_50 : f32 to vector<1x128xf32>
      %c0_51 = arith.constant 0 : index
      %c0_52 = arith.constant 0 : index
      %64 = vector.load %arg11[%c0_51, %c0_52] : memref<1x128xf32, #tpu.memory_space<vmem>>, vector<1x128xf32>
      tpu.vector_store %arg11[%c0_51, %c0_52], %63 {strides = array<i32>} : memref<1x128xf32, #tpu.memory_space<vmem>>, vector<1x128xf32>,
      %cst_53 = arith.constant 0.000000e+00 : f32
      %65 = vector.broadcast %cst_53 : f32 to vector<8x128xf32>
      %c0_54 = arith.constant 0 : index
      %c0_55 = arith.constant 0 : index
      %66 = vector.load %arg6[%c0_54, %c0_55] : memref<8x128xf32, #tpu.memory_space<vmem>>, vector<8x128xf32>
      tpu.vector_store %arg6[%c0_54, %c0_55], %65 {strides = array<i32>} : memref<8x128xf32, #tpu.memory_space<vmem>>, vector<8x128xf32>,
    } else {
    }
    %c0 = arith.constant 0 : index
    %c0_1 = arith.constant 0 : index
    %3 = vector.load %arg2[%c0, %c0_1] : memref<8x128xf32, #tpu.memory_space<vmem>>, vector<8x128xf32>
    %c0_2 = arith.constant 0 : index
    %c0_3 = arith.constant 0 : index
    %4 = vector.load %arg3[%c0_2, %c0_3] : memref<8x128xf32, #tpu.memory_space<vmem>>, vector<8x128xf32>
    %5 = arith.mulf %3, %3 : vector<8x128xf32>
    %cst = arith.constant dense<0.000000e+00> : vector<8xf32>
    %6 = vector.multi_reduction <add>, %5, %cst [1] : vector<8x128xf32> to vector<8xf32>
    %7 = vector.shape_cast %6 : vector<8xf32> to vector<8x1xf32>
    %cst_4 = arith.constant 1.000000e-24 : f32
    %8 = vector.broadcast %cst_4 : f32 to vector<8x1xf32>
    %9 = arith.maximumf %7, %8 : vector<8x1xf32>
    %10 = math.rsqrt %9 : vector<8x1xf32>
    %11 = vector.broadcast %10 : vector<8x1xf32> to vector<8x128xf32>
    %12 = arith.mulf %3, %11 : vector<8x128xf32>
    %13 = arith.mulf %4, %4 : vector<8x128xf32>
    %cst_5 = arith.constant dense<0.000000e+00> : vector<8xf32>
    %14 = vector.multi_reduction <add>, %13, %cst_5 [1] : vector<8x128xf32> to vector<8xf32>
    %15 = vector.shape_cast %14 : vector<8xf32> to vector<8x1xf32>
    %cst_6 = arith.constant 1.000000e-24 : f32
    %16 = vector.broadcast %cst_6 : f32 to vector<8x1xf32>
    %17 = arith.maximumf %15, %16 : vector<8x1xf32>
    %18 = math.rsqrt %17 : vector<8x1xf32>
    %19 = vector.broadcast %18 : vector<8x1xf32> to vector<8x128xf32>
    %20 = arith.mulf %4, %19 : vector<8x128xf32>
    %c0_7 = arith.constant 0 : index
    %c0_8 = arith.constant 0 : index
    %21 = vector.load %arg4[%c0_7, %c0_8] : memref<8x128xf32, #tpu.memory_space<vmem>>, vector<8x128xf32>
    tpu.vector_store %arg4[%c0_7, %c0_8], %12 {strides = array<i32>} : memref<8x128xf32, #tpu.memory_space<vmem>>, vector<8x128xf32>,
    %c0_9 = arith.constant 0 : index
    %c0_10 = arith.constant 0 : index
    %22 = vector.load %arg5[%c0_9, %c0_10] : memref<8x128xf32, #tpu.memory_space<vmem>>, vector<8x128xf32>
    tpu.vector_store %arg5[%c0_9, %c0_10], %20 {strides = array<i32>} : memref<8x128xf32, #tpu.memory_space<vmem>>, vector<8x128xf32>,
    %23 = arith.subf %12, %20 : vector<8x128xf32>
    %c0_11 = arith.constant 0 : index
    %c0_12 = arith.constant 0 : index
    %24 = vector.load %arg7[%c0_11, %c0_12] : memref<1x128xf32, #tpu.memory_space<vmem>>, vector<1x128xf32>
    %cst_13 = arith.constant dense<0.000000e+00> : vector<128xf32>
    %25 = vector.multi_reduction <add>, %12, %cst_13 [0] : vector<8x128xf32> to vector<128xf32>
    %26 = vector.shape_cast %25 : vector<128xf32> to vector<1x128xf32>
    %27 = arith.addf %24, %26 : vector<1x128xf32>
    %c0_14 = arith.constant 0 : index
    %c0_15 = arith.constant 0 : index
    %28 = vector.load %arg7[%c0_14, %c0_15] : memref<1x128xf32, #tpu.memory_space<vmem>>, vector<1x128xf32>
    tpu.vector_store %arg7[%c0_14, %c0_15], %27 {strides = array<i32>} : memref<1x128xf32, #tpu.memory_space<vmem>>, vector<1x128xf32>,
    %c0_16 = arith.constant 0 : index
    %c0_17 = arith.constant 0 : index
    %29 = vector.load %arg8[%c0_16, %c0_17] : memref<1x128xf32, #tpu.memory_space<vmem>>, vector<1x128xf32>
    %cst_18 = arith.constant dense<0.000000e+00> : vector<128xf32>
    %30 = vector.multi_reduction <add>, %20, %cst_18 [0] : vector<8x128xf32> to vector<128xf32>
    %31 = vector.shape_cast %30 : vector<128xf32> to vector<1x128xf32>
    %32 = arith.addf %29, %31 : vector<1x128xf32>
    %c0_19 = arith.constant 0 : index
    %c0_20 = arith.constant 0 : index
    %33 = vector.load %arg8[%c0_19, %c0_20] : memref<1x128xf32, #tpu.memory_space<vmem>>, vector<1x128xf32>
    tpu.vector_store %arg8[%c0_19, %c0_20], %32 {strides = array<i32>} : memref<1x128xf32, #tpu.memory_space<vmem>>, vector<1x128xf32>,
    %c0_21 = arith.constant 0 : index
    %c0_22 = arith.constant 0 : index
    %34 = vector.load %arg9[%c0_21, %c0_22] : memref<1x128xf32, #tpu.memory_space<vmem>>, vector<1x128xf32>
    %35 = arith.mulf %12, %12 : vector<8x128xf32>
    %cst_23 = arith.constant dense<0.000000e+00> : vector<128xf32>
    %36 = vector.multi_reduction <add>, %35, %cst_23 [0] : vector<8x128xf32> to vector<128xf32>
    %37 = vector.shape_cast %36 : vector<128xf32> to vector<1x128xf32>
    %38 = arith.addf %34, %37 : vector<1x128xf32>
    %c0_24 = arith.constant 0 : index
    %c0_25 = arith.constant 0 : index
    %39 = vector.load %arg9[%c0_24, %c0_25] : memref<1x128xf32, #tpu.memory_space<vmem>>, vector<1x128xf32>
    tpu.vector_store %arg9[%c0_24, %c0_25], %38 {strides = array<i32>} : memref<1x128xf32, #tpu.memory_space<vmem>>, vector<1x128xf32>,
    %c0_26 = arith.constant 0 : index
    %c0_27 = arith.constant 0 : index
    %40 = vector.load %arg10[%c0_26, %c0_27] : memref<1x128xf32, #tpu.memory_space<vmem>>, vector<1x128xf32>
    %41 = arith.mulf %20, %20 : vector<8x128xf32>
    %cst_28 = arith.constant dense<0.000000e+00> : vector<128xf32>
    %42 = vector.multi_reduction <add>, %41, %cst_28 [0] : vector<8x128xf32> to vector<128xf32>
    %43 = vector.shape_cast %42 : vector<128xf32> to vector<1x128xf32>
    %44 = arith.addf %40, %43 : vector<1x128xf32>
    %c0_29 = arith.constant 0 : index
    %c0_30 = arith.constant 0 : index
    %45 = vector.load %arg10[%c0_29, %c0_30] : memref<1x128xf32, #tpu.memory_space<vmem>>, vector<1x128xf32>
    tpu.vector_store %arg10[%c0_29, %c0_30], %44 {strides = array<i32>} : memref<1x128xf32, #tpu.memory_space<vmem>>, vector<1x128xf32>,
    %c0_31 = arith.constant 0 : index
    %c0_32 = arith.constant 0 : index
    %46 = vector.load %arg11[%c0_31, %c0_32] : memref<1x128xf32, #tpu.memory_space<vmem>>, vector<1x128xf32>
    %47 = arith.mulf %23, %23 : vector<8x128xf32>
    %cst_33 = arith.constant dense<0.000000e+00> : vector<128xf32>
    %48 = vector.multi_reduction <add>, %47, %cst_33 [0] : vector<8x128xf32> to vector<128xf32>
    %49 = vector.shape_cast %48 : vector<128xf32> to vector<1x128xf32>
    %50 = arith.addf %46, %49 : vector<1x128xf32>
    %c0_34 = arith.constant 0 : index
    %c0_35 = arith.constant 0 : index
    %51 = vector.load %arg11[%c0_34, %c0_35] : memref<1x128xf32, #tpu.memory_space<vmem>>, vector<1x128xf32>
    tpu.vector_store %arg11[%c0_34, %c0_35], %50 {strides = array<i32>} : memref<1x128xf32, #tpu.memory_space<vmem>>, vector<1x128xf32>,
    %c0_i32_36 = arith.constant 0 : i32
    %52 = arith.cmpi eq, %arg1, %c0_i32_36 : i32
    %53 = arith.extui %52 : i1 to i32
    %c0_i32_37 = arith.constant 0 : i32
    %54 = arith.cmpi ne, %53, %c0_i32_37 : i32
    scf.if %54 {
      %c0_38 = arith.constant 0 : index
      %c0_39 = arith.constant 0 : index
      %55 = vector.load %arg7[%c0_38, %c0_39] : memref<1x128xf32, #tpu.memory_space<vmem>>, vector<1x128xf32>
      %c0_40 = arith.constant 0 : index
      %c0_41 = arith.constant 0 : index
      %56 = vector.load %arg6[%c0_40, %c0_41] : memref<8x128xf32, #tpu.memory_space<vmem>>, vector<1x128xf32>
      tpu.vector_store %arg6[%c0_40, %c0_41], %55 {strides = array<i32>} : memref<8x128xf32, #tpu.memory_space<vmem>>, vector<1x128xf32>,
      %c0_42 = arith.constant 0 : index
      %c0_43 = arith.constant 0 : index
      %57 = vector.load %arg8[%c0_42, %c0_43] : memref<1x128xf32, #tpu.memory_space<vmem>>, vector<1x128xf32>
      %c1 = arith.constant 1 : index
      %c0_44 = arith.constant 0 : index
      %58 = vector.load %arg6[%c1, %c0_44] : memref<8x128xf32, #tpu.memory_space<vmem>>, vector<1x128xf32>
      tpu.vector_store %arg6[%c1, %c0_44], %57 {strides = array<i32>} : memref<8x128xf32, #tpu.memory_space<vmem>>, vector<1x128xf32>,
      %c0_45 = arith.constant 0 : index
      %c0_46 = arith.constant 0 : index
      %59 = vector.load %arg9[%c0_45, %c0_46] : memref<1x128xf32, #tpu.memory_space<vmem>>, vector<1x128xf32>
      %c2 = arith.constant 2 : index
      %c0_47 = arith.constant 0 : index
      %60 = vector.load %arg6[%c2, %c0_47] : memref<8x128xf32, #tpu.memory_space<vmem>>, vector<1x128xf32>
      tpu.vector_store %arg6[%c2, %c0_47], %59 {strides = array<i32>} : memref<8x128xf32, #tpu.memory_space<vmem>>, vector<1x128xf32>,
      %c0_48 = arith.constant 0 : index
      %c0_49 = arith.constant 0 : index
      %61 = vector.load %arg10[%c0_48, %c0_49] : memref<1x128xf32, #tpu.memory_space<vmem>>, vector<1x128xf32>
      %c3 = arith.constant 3 : index
      %c0_50 = arith.constant 0 : index
      %62 = vector.load %arg6[%c3, %c0_50] : memref<8x128xf32, #tpu.memory_space<vmem>>, vector<1x128xf32>
      tpu.vector_store %arg6[%c3, %c0_50], %61 {strides = array<i32>} : memref<8x128xf32, #tpu.memory_space<vmem>>, vector<1x128xf32>,
      %c0_51 = arith.constant 0 : index
      %c0_52 = arith.constant 0 : index
      %63 = vector.load %arg11[%c0_51, %c0_52] : memref<1x128xf32, #tpu.memory_space<vmem>>, vector<1x128xf32>
      %c4 = arith.constant 4 : index
      %c0_53 = arith.constant 0 : index
      %64 = vector.load %arg6[%c4, %c0_53] : memref<8x128xf32, #tpu.memory_space<vmem>>, vector<1x128xf32>
      tpu.vector_store %arg6[%c4, %c0_53], %63 {strides = array<i32>} : memref<8x128xf32, #tpu.memory_space<vmem>>, vector<1x128xf32>,
    } else {
    }
    return
  }
  func.func @transform_0(%arg0: i32, %arg1: i32) -> (i32, i32) {
    %c1_i32 = arith.constant 1 : i32
    %0 = arith.muli %arg0, %c1_i32 : i32
    %1 = arith.addi %0, %arg1 : i32
    %c0_i32 = arith.constant 0 : i32
    %c0_i32_0 = arith.constant 0 : i32
    return %1, %c0_i32 : i32, i32
  }
  func.func @transform_1(%arg0: i32, %arg1: i32) -> (i32, i32) {
    %c1_i32 = arith.constant 1 : i32
    %0 = arith.muli %arg0, %c1_i32 : i32
    %1 = arith.addi %0, %arg1 : i32
    %c0_i32 = arith.constant 0 : i32
    %c0_i32_0 = arith.constant 0 : i32
    return %1, %c0_i32 : i32, i32
  }
  func.func @transform_2(%arg0: i32, %arg1: i32) -> (i32, i32) {
    %c1_i32 = arith.constant 1 : i32
    %0 = arith.muli %arg0, %c1_i32 : i32
    %1 = arith.addi %0, %arg1 : i32
    %c0_i32 = arith.constant 0 : i32
    %c0_i32_0 = arith.constant 0 : i32
    return %1, %c0_i32 : i32, i32
  }
  func.func @transform_3(%arg0: i32, %arg1: i32) -> (i32, i32) {
    %c1_i32 = arith.constant 1 : i32
    %0 = arith.muli %arg0, %c1_i32 : i32
    %1 = arith.addi %0, %arg1 : i32
    %c0_i32 = arith.constant 0 : i32
    %c0_i32_0 = arith.constant 0 : i32
    return %1, %c0_i32 : i32, i32
  }
  func.func @transform_4(%arg0: i32, %arg1: i32) -> (i32, i32) {
    %c0_i32 = arith.constant 0 : i32
    %c0_i32_0 = arith.constant 0 : i32
    return %arg0, %c0_i32 : i32, i32
  }
}

module attributes {stable_mosaic.version = 11 : i64} {
  func.func @_cov_kernel(%arg0: i32, %arg1: i32, %arg2: memref<1xi32, #tpu.memory_space<smem>>, %arg3: memref<1xi32, #tpu.memory_space<smem>>, %arg4: memref<8x128xf32, #tpu.memory_space<vmem>>, %arg5: memref<8x128xf32, #tpu.memory_space<vmem>>, %arg6: memref<8x128xf32, #tpu.memory_space<vmem>>, %arg7: memref<8x128xf32, #tpu.memory_space<vmem>>, %arg8: memref<128x1xf32, #tpu.memory_space<vmem>>, %arg9: memref<1x128xf32, #tpu.memory_space<vmem>>, %arg10: memref<128x1xf32, #tpu.memory_space<vmem>>, %arg11: memref<1x128xf32, #tpu.memory_space<vmem>>, %arg12: memref<1x128xf32, #tpu.memory_space<vmem>>, %arg13: memref<128x128xf32, #tpu.memory_space<vmem>>, %arg14: memref<128x128xf32, #tpu.memory_space<vmem>>) attributes {dimension_semantics = [#tpu.dimension_semantics<parallel>, #tpu.dimension_semantics<arbitrary>], iteration_bounds = array<i64: 1, 1>, scalar_prefetch = 2 : i64, scratch_operands = 2 : i64, tpu.core_type = #tpu.core_type<tc>, window_params = [{transform_indices = @transform_0, window_bounds = array<i64: 8, 128>}, {transform_indices = @transform_1, window_bounds = array<i64: 8, 128>}, {transform_indices = @transform_2, window_bounds = array<i64: 8, 128>}, {transform_indices = @transform_3, window_bounds = array<i64: 8, 128>}, {transform_indices = @transform_4, window_bounds = array<i64: 128, 1>}, {transform_indices = @transform_5, window_bounds = array<i64: 1, 128>}, {transform_indices = @transform_6, window_bounds = array<i64: 128, 1>}, {transform_indices = @transform_7, window_bounds = array<i64: 1, 128>}, {transform_indices = @transform_8, window_bounds = array<i64: 1, 128>}]} {
    %c0_i32 = arith.constant 0 : i32
    %0 = arith.cmpi eq, %arg1, %c0_i32 : i32
    %1 = arith.extui %0 : i1 to i32
    %c0_i32_0 = arith.constant 0 : i32
    %2 = arith.cmpi ne, %1, %c0_i32_0 : i32
    scf.if %2 {
      %cst_19 = arith.constant 0.000000e+00 : f32
      %18 = vector.broadcast %cst_19 : f32 to vector<128x128xf32>
      %c0_20 = arith.constant 0 : index
      %c0_21 = arith.constant 0 : index
      %19 = vector.load %arg13[%c0_20, %c0_21] : memref<128x128xf32, #tpu.memory_space<vmem>>, vector<128x128xf32>
      tpu.vector_store %arg13[%c0_20, %c0_21], %18 {strides = array<i32>} : memref<128x128xf32, #tpu.memory_space<vmem>>, vector<128x128xf32>,
      %cst_22 = arith.constant 0.000000e+00 : f32
      %20 = vector.broadcast %cst_22 : f32 to vector<128x128xf32>
      %c0_23 = arith.constant 0 : index
      %c0_24 = arith.constant 0 : index
      %21 = vector.load %arg14[%c0_23, %c0_24] : memref<128x128xf32, #tpu.memory_space<vmem>>, vector<128x128xf32>
      tpu.vector_store %arg14[%c0_23, %c0_24], %20 {strides = array<i32>} : memref<128x128xf32, #tpu.memory_space<vmem>>, vector<128x128xf32>,
      %cst_25 = arith.constant 0.000000e+00 : f32
      %22 = vector.broadcast %cst_25 : f32 to vector<1x128xf32>
      %c0_26 = arith.constant 0 : index
      %c0_27 = arith.constant 0 : index
      %23 = vector.load %arg12[%c0_26, %c0_27] : memref<1x128xf32, #tpu.memory_space<vmem>>, vector<1x128xf32>
      tpu.vector_store %arg12[%c0_26, %c0_27], %22 {strides = array<i32>} : memref<1x128xf32, #tpu.memory_space<vmem>>, vector<1x128xf32>,
    } else {
    }
    %c0 = arith.constant 0 : index
    %c0_1 = arith.constant 0 : index
    %3 = vector.load %arg13[%c0, %c0_1] : memref<128x128xf32, #tpu.memory_space<vmem>>, vector<128x128xf32>
    %c0_2 = arith.constant 0 : index
    %c0_3 = arith.constant 0 : index
    %4 = vector.load %arg4[%c0_2, %c0_3] : memref<8x128xf32, #tpu.memory_space<vmem>>, vector<8x128xf32>
    %c0_4 = arith.constant 0 : index
    %c0_5 = arith.constant 0 : index
    %5 = vector.load %arg5[%c0_4, %c0_5] : memref<8x128xf32, #tpu.memory_space<vmem>>, vector<8x128xf32>
    %cst = arith.constant dense<0.000000e+00> : vector<128x128xf32>
    %6 = tpu.matmul %4, %5, %cst {dimension_numbers = #tpu.dot_dimension_numbers<[0], [0], [1], [1], [0, 1, 1, 1], [], []>} : vector<8x128xf32>, vector<8x128xf32>, vector<128x128xf32> -> vector<128x128xf32>
    %7 = arith.addf %3, %6 : vector<128x128xf32>
    %c0_6 = arith.constant 0 : index
    %c0_7 = arith.constant 0 : index
    %8 = vector.load %arg13[%c0_6, %c0_7] : memref<128x128xf32, #tpu.memory_space<vmem>>, vector<128x128xf32>
    tpu.vector_store %arg13[%c0_6, %c0_7], %7 {strides = array<i32>} : memref<128x128xf32, #tpu.memory_space<vmem>>, vector<128x128xf32>,
    %c0_8 = arith.constant 0 : index
    %c0_9 = arith.constant 0 : index
    %9 = vector.load %arg14[%c0_8, %c0_9] : memref<128x128xf32, #tpu.memory_space<vmem>>, vector<128x128xf32>
    %c0_10 = arith.constant 0 : index
    %c0_11 = arith.constant 0 : index
    %10 = vector.load %arg6[%c0_10, %c0_11] : memref<8x128xf32, #tpu.memory_space<vmem>>, vector<8x128xf32>
    %c0_12 = arith.constant 0 : index
    %c0_13 = arith.constant 0 : index
    %11 = vector.load %arg7[%c0_12, %c0_13] : memref<8x128xf32, #tpu.memory_space<vmem>>, vector<8x128xf32>
    %cst_14 = arith.constant dense<0.000000e+00> : vector<128x128xf32>
    %12 = tpu.matmul %10, %11, %cst_14 {dimension_numbers = #tpu.dot_dimension_numbers<[0], [0], [1], [1], [0, 1, 1, 1], [], []>} : vector<8x128xf32>, vector<8x128xf32>, vector<128x128xf32> -> vector<128x128xf32>
    %13 = arith.addf %9, %12 : vector<128x128xf32>
    %c0_15 = arith.constant 0 : index
    %c0_16 = arith.constant 0 : index
    %14 = vector.load %arg14[%c0_15, %c0_16] : memref<128x128xf32, #tpu.memory_space<vmem>>, vector<128x128xf32>
    tpu.vector_store %arg14[%c0_15, %c0_16], %13 {strides = array<i32>} : memref<128x128xf32, #tpu.memory_space<vmem>>, vector<128x128xf32>,
    %c0_i32_17 = arith.constant 0 : i32
    %15 = arith.cmpi eq, %arg1, %c0_i32_17 : i32
    %16 = arith.extui %15 : i1 to i32
    %c0_i32_18 = arith.constant 0 : i32
    %17 = arith.cmpi ne, %16, %c0_i32_18 : i32
    scf.if %17 {
      %c0_19 = arith.constant 0 : index
      %c0_20 = arith.constant 0 : index
      %18 = vector.load %arg13[%c0_19, %c0_20] : memref<128x128xf32, #tpu.memory_space<vmem>>, vector<128x128xf32>
      %c0_21 = arith.constant 0 : index
      %c0_22 = arith.constant 0 : index
      %19 = vector.load %arg8[%c0_21, %c0_22] : memref<128x1xf32, #tpu.memory_space<vmem>>, vector<128x1xf32>
      %c0_23 = arith.constant 0 : index
      %c0_24 = arith.constant 0 : index
      %20 = vector.load %arg9[%c0_23, %c0_24] : memref<1x128xf32, #tpu.memory_space<vmem>>, vector<1x128xf32>
      %21 = vector.broadcast %19 : vector<128x1xf32> to vector<128x128xf32>
      %22 = vector.broadcast %20 : vector<1x128xf32> to vector<128x128xf32>
      %23 = arith.mulf %21, %22 : vector<128x128xf32>
      %cst_25 = arith.constant 8.000000e+00 : f32
      %24 = vector.broadcast %cst_25 : f32 to vector<128x128xf32>
      %25 = arith.mulf %24, %23 : vector<128x128xf32>
      %26 = arith.subf %18, %25 : vector<128x128xf32>
      %c0_26 = arith.constant 0 : index
      %c0_27 = arith.constant 0 : index
      %27 = vector.load %arg14[%c0_26, %c0_27] : memref<128x128xf32, #tpu.memory_space<vmem>>, vector<128x128xf32>
      %c0_28 = arith.constant 0 : index
      %c0_29 = arith.constant 0 : index
      %28 = vector.load %arg10[%c0_28, %c0_29] : memref<128x1xf32, #tpu.memory_space<vmem>>, vector<128x1xf32>
      %c0_30 = arith.constant 0 : index
      %c0_31 = arith.constant 0 : index
      %29 = vector.load %arg11[%c0_30, %c0_31] : memref<1x128xf32, #tpu.memory_space<vmem>>, vector<1x128xf32>
      %30 = vector.broadcast %28 : vector<128x1xf32> to vector<128x128xf32>
      %31 = vector.broadcast %29 : vector<1x128xf32> to vector<128x128xf32>
      %32 = arith.mulf %30, %31 : vector<128x128xf32>
      %cst_32 = arith.constant 8.000000e+00 : f32
      %33 = vector.broadcast %cst_32 : f32 to vector<128x128xf32>
      %34 = arith.mulf %33, %32 : vector<128x128xf32>
      %35 = arith.subf %27, %34 : vector<128x128xf32>
      %36 = arith.index_cast %arg0 : i32 to index
      %37 = memref.load %arg2[%36] : memref<1xi32, #tpu.memory_space<smem>>
      %38 = arith.index_cast %arg0 : i32 to index
      %39 = memref.load %arg3[%38] : memref<1xi32, #tpu.memory_space<smem>>
      %40 = arith.cmpi eq, %37, %39 : i32
      %cst_33 = arith.constant 1.000000e+00 : f32
      %cst_34 = arith.constant 2.000000e+00 : f32
      %41 = arith.select %40, %cst_33, %cst_34 : f32
      %cst_35 = arith.constant 0.0204081628 : f32
      %42 = arith.mulf %41, %cst_35 : f32
      %43 = arith.mulf %26, %26 : vector<128x128xf32>
      %44 = vector.shape_cast %43 : vector<128x128xf32> to vector<1x128x128xf32>
      %cst_36 = arith.constant dense<0.000000e+00> : vector<1xf32>
      %45 = vector.multi_reduction <add>, %44, %cst_36 [1, 2] : vector<1x128x128xf32> to vector<1xf32>
      %46 = vector.shape_cast %45 : vector<1xf32> to vector<1x1x1xf32>
      %47 = vector.extract %46[0, 0, 0] : f32 from vector<1x1x1xf32>
      %48 = arith.mulf %35, %35 : vector<128x128xf32>
      %49 = vector.shape_cast %48 : vector<128x128xf32> to vector<1x128x128xf32>
      %cst_37 = arith.constant dense<0.000000e+00> : vector<1xf32>
      %50 = vector.multi_reduction <add>, %49, %cst_37 [1, 2] : vector<1x128x128xf32> to vector<1xf32>
      %51 = vector.shape_cast %50 : vector<1xf32> to vector<1x1x1xf32>
      %52 = vector.extract %51[0, 0, 0] : f32 from vector<1x1x1xf32>
      %53 = arith.addf %47, %52 : f32
      %54 = arith.mulf %53, %42 : f32
      %55 = tpu.iota {dimensions = array<i32: 1>} : vector<1x128xi32>
      %c0_i32_38 = arith.constant 0 : i32
      %56 = vector.broadcast %c0_i32_38 : i32 to vector<1x128xi32>
      %57 = arith.cmpi eq, %55, %56 : vector<1x128xi32>
      %cst_39 = arith.constant 0.000000e+00 : f32
      %58 = vector.broadcast %54 : f32 to vector<1x128xf32>
      %59 = vector.broadcast %cst_39 : f32 to vector<1x128xf32>
      %60 = arith.select %57, %58, %59 : vector<1x128xi1>, vector<1x128xf32>
      %c0_40 = arith.constant 0 : index
      %c0_41 = arith.constant 0 : index
      %61 = vector.load %arg12[%c0_40, %c0_41] : memref<1x128xf32, #tpu.memory_space<vmem>>, vector<1x128xf32>
      tpu.vector_store %arg12[%c0_40, %c0_41], %60 {strides = array<i32>} : memref<1x128xf32, #tpu.memory_space<vmem>>, vector<1x128xf32>,
    } else {
    }
    return
  }
  func.func @transform_0(%arg0: i32, %arg1: i32, %arg2: memref<1xi32, #tpu.memory_space<smem>>, %arg3: memref<1xi32, #tpu.memory_space<smem>>) -> (i32, i32) {
    %0 = arith.index_cast %arg0 : i32 to index
    %1 = memref.load %arg2[%0] : memref<1xi32, #tpu.memory_space<smem>>
    %c0_i32 = arith.constant 0 : i32
    return %arg1, %1 : i32, i32
  }
  func.func @transform_1(%arg0: i32, %arg1: i32, %arg2: memref<1xi32, #tpu.memory_space<smem>>, %arg3: memref<1xi32, #tpu.memory_space<smem>>) -> (i32, i32) {
    %0 = arith.index_cast %arg0 : i32 to index
    %1 = memref.load %arg3[%0] : memref<1xi32, #tpu.memory_space<smem>>
    %c0_i32 = arith.constant 0 : i32
    return %arg1, %1 : i32, i32
  }
  func.func @transform_2(%arg0: i32, %arg1: i32, %arg2: memref<1xi32, #tpu.memory_space<smem>>, %arg3: memref<1xi32, #tpu.memory_space<smem>>) -> (i32, i32) {
    %0 = arith.index_cast %arg0 : i32 to index
    %1 = memref.load %arg2[%0] : memref<1xi32, #tpu.memory_space<smem>>
    %c0_i32 = arith.constant 0 : i32
    return %arg1, %1 : i32, i32
  }
  func.func @transform_3(%arg0: i32, %arg1: i32, %arg2: memref<1xi32, #tpu.memory_space<smem>>, %arg3: memref<1xi32, #tpu.memory_space<smem>>) -> (i32, i32) {
    %0 = arith.index_cast %arg0 : i32 to index
    %1 = memref.load %arg3[%0] : memref<1xi32, #tpu.memory_space<smem>>
    %c0_i32 = arith.constant 0 : i32
    return %arg1, %1 : i32, i32
  }
  func.func @transform_4(%arg0: i32, %arg1: i32, %arg2: memref<1xi32, #tpu.memory_space<smem>>, %arg3: memref<1xi32, #tpu.memory_space<smem>>) -> (i32, i32) {
    %0 = arith.index_cast %arg0 : i32 to index
    %1 = memref.load %arg2[%0] : memref<1xi32, #tpu.memory_space<smem>>
    %c0_i32 = arith.constant 0 : i32
    %c0_i32_0 = arith.constant 0 : i32
    return %1, %c0_i32 : i32, i32
  }
  func.func @transform_5(%arg0: i32, %arg1: i32, %arg2: memref<1xi32, #tpu.memory_space<smem>>, %arg3: memref<1xi32, #tpu.memory_space<smem>>) -> (i32, i32) {
    %0 = arith.index_cast %arg0 : i32 to index
    %1 = memref.load %arg3[%0] : memref<1xi32, #tpu.memory_space<smem>>
    %c0_i32 = arith.constant 0 : i32
    %c0_i32_0 = arith.constant 0 : i32
    return %c0_i32, %1 : i32, i32
  }
  func.func @transform_6(%arg0: i32, %arg1: i32, %arg2: memref<1xi32, #tpu.memory_space<smem>>, %arg3: memref<1xi32, #tpu.memory_space<smem>>) -> (i32, i32) {
    %0 = arith.index_cast %arg0 : i32 to index
    %1 = memref.load %arg2[%0] : memref<1xi32, #tpu.memory_space<smem>>
    %c0_i32 = arith.constant 0 : i32
    %c0_i32_0 = arith.constant 0 : i32
    return %1, %c0_i32 : i32, i32
  }
  func.func @transform_7(%arg0: i32, %arg1: i32, %arg2: memref<1xi32, #tpu.memory_space<smem>>, %arg3: memref<1xi32, #tpu.memory_space<smem>>) -> (i32, i32) {
    %0 = arith.index_cast %arg0 : i32 to index
    %1 = memref.load %arg3[%0] : memref<1xi32, #tpu.memory_space<smem>>
    %c0_i32 = arith.constant 0 : i32
    %c0_i32_0 = arith.constant 0 : i32
    return %c0_i32, %1 : i32, i32
  }
  func.func @transform_8(%arg0: i32, %arg1: i32, %arg2: memref<1xi32, #tpu.memory_space<smem>>, %arg3: memref<1xi32, #tpu.memory_space<smem>>) -> (i32, i32) {
    %c0_i32 = arith.constant 0 : i32
    %c0_i32_0 = arith.constant 0 : i32
    return %c0_i32, %arg0 : i32, i32
  }
}

</mosaic_0001>

<bundles_post_ra>
// kernel: vicreg_loss.2
= control target key start
LH: loop header
LB: loop body
LE: loop exit
PB: predicated region body
PF: predicated region fallthrough
CT: control target
= control target key end

     0   :  { %v225_v2 = vmov 0.0   ;;  %s281_s0 = inlined_call_operand.vmem [shape: f32[8,128], index: 0, kind: input, shape index: {}]   ;;  %s282_s1 = inlined_call_operand.vmem [shape: f32[8,128], index: 1, kind: input, shape index: {}]   ;;  %s283_s4 = inlined_call_operand.vmem [shape: f32[8,128], index: 4, kind: output, shape index: {2}]   ;;  %s284_s2 = inlined_call_operand.vmem [shape: f32[8,128], index: 2, kind: output, shape index: {0}]   ;;  %s285_s3 = inlined_call_operand.vmem [shape: f32[8,128], index: 3, kind: output, shape index: {1}]  }
   0x1   :  { %v80_v0 = vld [vmem:[%s281_s0] sm:$0xff]  ;;  %74 = vst [vmem:[#allocation2] sm:$0x1] %v225_v2  ;;  %76 = vst [vmem:[#allocation4] sm:$0x1] %v225_v2 }
   0x2   :  { %v81_v1 = vld [vmem:[%s282_s1] sm:$0xff]  ;;  %79 = vst [vmem:[%s283_s4] sm:$0xff] %v225_v2  ;;  %75 = vst [vmem:[#allocation3] sm:$0x1] %v225_v2  ;;  %v82_v3 = vmul.f32 %v80_v0, %v80_v0 }
   0x3   :  { %77 = vst [vmem:[#allocation5] sm:$0x1] %v225_v2  ;;  %78 = vst [vmem:[#allocation6] sm:$0x1] %v225_v2  ;;  %v88_v4 = vmul.f32 %v81_v1, %v81_v1 }
   0x4   :  { %83 = vadd.xlane.f32.xlu0 %v82_v3 }
   0x8   :  { %89 = vadd.xlane.f32.xlu0 %v88_v4  ;;  %v97_v31 = vld [vmem:[#allocation2] sm:$0x1]  ;;  %v115_v37 = vld [vmem:[#allocation4] sm:$0x1] }
   0x9   :  { %v106_v43 = vld [vmem:[#allocation3] sm:$0x1] }
   0xa   :  { %v125_v49 = vld [vmem:[#allocation5] sm:$0x1]  ;;  %v135_v52 = vld [vmem:[#allocation6] sm:$0x1] }
  0x91   :  { %v84_v5 = vpop.xlane.xlu0 %83 }
  0x92   :  { %v85_v6 = vmax.f32 %v84_v5, 1e-24 }
  0x94   :  { %221 = vrsqrt.f32 %v85_v6 }
  0x95   :  { %v90_v7 = vpop.xlane.xlu0 %89 }
  0x96   :  { %v91_v8 = vmax.f32 %v90_v7, 1e-24 }
  0x98   :  { %223 = vrsqrt.f32 %v91_v8 }
  0x9e   :  { %v222_v9 = vpop.eup %221 }
  0x9f   :  { %v87_v10 = vmul.f32 %v222_v9, %v80_v0 }
  0xa1   :  { %94 = vst [vmem:[%s284_s2] sm:$0xff] %v87_v10  ;;  %v98_v11 = vrot.slane %v87_v10, 4  ;;  %v116_v12 = vmul.f32 %v87_v10, %v87_v10 }
  0xa2   :  { %v224_v13 = vpop.eup %223 }
  0xa3   :  { %v99_v14 = vadd.f32 %v98_v11, %v87_v10  ;;  %v117_v15 = vrot.slane %v116_v12, 4  ;;  %v93_v16 = vmul.f32 %v224_v13, %v81_v1 }
  0xa5   :  { %v100_v17 = vrot.slane %v99_v14, 2  ;;  %v118_v18 = vadd.f32 %v117_v15, %v116_v12  ;;  %95 = vst [vmem:[%s285_s3] sm:$0xff] %v93_v16  ;;  %v96_v19 = vsub.f32 %v87_v10, %v93_v16  ;;  %v107_v20 = vrot.slane %v93_v16, 4 }
  0xa6   :  { %v126_v21 = vmul.f32 %v93_v16, %v93_v16 }
  0xa7   :  { %v101_v22 = vadd.f32 %v100_v17, %v99_v14  ;;  %v119_v23 = vrot.slane %v118_v18, 2  ;;  %v108_v24 = vadd.f32 %v107_v20, %v93_v16  ;;  %v136_v25 = vmul.f32 %v96_v19, %v96_v19 }
  0xa8   :  { %v127_v26 = vrot.slane %v126_v21, 4 }
  0xa9   :  { %v102_v27 = vrot.slane %v101_v22, 1  ;;  %v120_v28 = vadd.f32 %v119_v23, %v118_v18  ;;  %v109_v29 = vrot.slane %v108_v24, 2  ;;  %v137_v30 = vrot.slane %v136_v25, 4 }
  0xaa   :  { %v128_v32 = vadd.f32 %v127_v26, %v126_v21 }
  0xab   :  { %v103_v33 = vadd.f32 %v102_v27, %v101_v22  ;;  %v121_v34 = vrot.slane %v120_v28, 1  ;;  %v110_v35 = vadd.f32 %v109_v29, %v108_v24  ;;  %v138_v36 = vadd.f32 %v137_v30, %v136_v25 }
  0xac   :  { %v129_v38 = vrot.slane %v128_v32, 2 }
  0xad   :  { %v104_v39 = vadd.f32 %v103_v33, %v97_v31  ;;  %v122_v40 = vadd.f32 %v121_v34, %v120_v28  ;;  %v111_v41 = vrot.slane %v110_v35, 1  ;;  %v139_v42 = vrot.slane %v138_v36, 2 }
  0xae   :  { %v130_v44 = vadd.f32 %v129_v38, %v128_v32 }
  0xaf   :  { %105 = vst [vmem:[#allocation2] sm:$0x1] %v104_v39  ;;  %v123_v45 = vadd.f32 %v122_v40, %v115_v37  ;;  %v112_v46 = vadd.f32 %v111_v41, %v110_v35  ;;  %v140_v47 = vadd.f32 %v139_v42, %v138_v36 }
  0xb0   :  { %v131_v48 = vrot.slane %v130_v44, 1 }
  0xb1   :  { %124 = vst [vmem:[#allocation4] sm:$0x1] %v123_v45  ;;  %v113_v50 = vadd.f32 %v112_v46, %v106_v43  ;;  %v141_v51 = vrot.slane %v140_v47, 1 }
  0xb2   :  { %v132_v53 = vadd.f32 %v131_v48, %v130_v44 }
  0xb3   :  { %114 = vst [vmem:[#allocation3] sm:$0x1] %v113_v50  ;;  %v142_v54 = vadd.f32 %v141_v51, %v140_v47 }
  0xb4   :  { %v133_v55 = vadd.f32 %v132_v53, %v125_v49 }
  0xb5   :  { %v143_v56 = vadd.f32 %v142_v54, %v135_v52 }
  0xb6   :  { %v148_v57 = vld [vmem:[#allocation2] sm:$0x1]  ;;  %134 = vst [vmem:[#allocation5] sm:$0x1] %v133_v55 }
  0xb7   :  { %149 = vst [vmem:[%s283_s4] sm:$0x1] %v148_v57  ;;  %144 = vst [vmem:[#allocation6] sm:$0x1] %v143_v56 }
  0xb8   :  { %v152_v58 = vld [vmem:[#allocation4] sm:$0x1] }
  0xb9   :  { %153 = vst [vmem:[%s283_s4 + $0x2] sm:$0x1] %v152_v58 }
  0xba   :  { %v150_v59 = vld [vmem:[#allocation3] sm:$0x1] }
  0xbb   :  { %151 = vst [vmem:[%s283_s4 + $0x1] sm:$0x1] %v150_v59 }
  0xbd   :  { %v154_v60 = vld [vmem:[#allocation5] sm:$0x1] }
  0xbe   :  { %155 = vst [vmem:[%s283_s4 + $0x3] sm:$0x1] %v154_v60  ;;  %v156_v61 = vld [vmem:[#allocation6] sm:$0x1] }
  0xbf   :  { %157 = vst [vmem:[%s283_s4 + $0x4] sm:$0x1] %v156_v61 }

// kernel: vicreg_loss.3
= control target key start
LH: loop header
LB: loop body
LE: loop exit
PB: predicated region body
PF: predicated region fallthrough
CT: control target
= control target key end

     0   :  { %v1373_v0 = vmov 0   ;;  %vm260_vm0 = vcmask 64512   ;;  %s1690_s0 = inlined_call_operand.<no memory space> [shape: s32[1], index: 0, kind: input, shape index: {}, may-alias: {0,1}]   ;;  %s1691_s2 = inlined_call_operand.vmem [shape: f32[8,128], index: 2, kind: input, shape index: {}, may-alias: {2,3}]   ;;  %s1692_s1 = inlined_call_operand.<no memory space> [shape: s32[1], index: 1, kind: input, shape index: {}, may-alias: {0,1}]   ;;  %s1693_s6 = inlined_call_operand.vmem [shape: f32[128,1], index: 6, kind: input, shape index: {}]   ;;  %s1694_s8 = inlined_call_operand.vmem [shape: f32[128,1], index: 8, kind: input, shape index: {}]   ;;  %s1695_s3 = inlined_call_operand.vmem [shape: f32[8,128], index: 3, kind: input, shape index: {}, may-alias: {2,3}]   ;;  %s1696_s4 = inlined_call_operand.vmem [shape: f32[8,128], index: 4, kind: input, shape index: {}, may-alias: {4,5}]   ;;  %s1697_s5 = inlined_call_operand.vmem [shape: f32[8,128], index: 5, kind: input, shape index: {}, may-alias: {4,5}]   ;;  %s1698_s7 = inlined_call_operand.vmem [shape: f32[1,128], index: 7, kind: input, shape index: {}]   ;;  %s1699_s9 = inlined_call_operand.vmem [shape: f32[1,128], index: 9, kind: input, shape index: {}]   ;;  %s1700_s10 = inlined_call_operand.vmem [shape: f32[1,128], index: 10, kind: output, shape index: {}]  }
   0x1   :  { %p124_p0 = scmp.lt.s32.totalorder %s1690_s0, 0  ;;  %s1241_s17 = sshll.u32 %s1690_s0, 4  ;;  %1371 = vset.pattern.permute.xlu1 %v1373_v0 }
   0x2   :  { %p149_p1 = scmp.lt.s32.totalorder %s1241_s17, 15  ;;  %p130_p2 = scmp.lt.s32.totalorder %s1692_s1, 0 }
   0x3   :  { %s1440_s20 = scalar_select %p124_p0, %s1690_s0, 0 }
   0x4   :  { %s1702_s17 = smov (!%p149_p1, %s1241_s17), 15  ;;  %p1100_p3 = scmp.eq.s32.totalorder %s1690_s0, %s1692_s1 }
   0x5   :  { %s1237_s21 = sshll.u32 %s1440_s20, 3  ;;  %s1242_s27 = sshll.u32 %s1702_s17, 3 }
   0x6   :  { %s127_s26 = scalar_lea.vmem %s1691_s2, %s1237_s21  ;;  %s1454_s30 = scalar_lea.vmem %s1693_s6, %s1242_s27 }
   0x7   :  { %v226_v1 = vld [vmem:[%s127_s26] sm:$0xff]  ;;  %s1460_s13 = scalar_select %p130_p2, %s1692_s1, 0  ;;  %v781_v3 = vld [vmem:[%s1454_s30 + $0x8] sm:$0xff]  ;;  %v782_v7 = vld [vmem:[%s1454_s30 + $0x10] sm:$0xff] }
   0x8   :  { %228 = vxpose.xlu0.b32.start.end [1/1] (short) %v226_v1, 128  ;;  %v780_v2 = vld [vmem:[%s1454_s30] sm:$0xff]  ;;  %s1466_s6 = scalar_lea.vmem %s1694_s8, %s1242_s27  ;;  %v783_v9 = vld [vmem:[%s1454_s30 + $0x18] sm:$0xff]  ;;  %v785_v13 = vld [vmem:[%s1454_s30 + $0x28] sm:$0xff]  ;;  %s139_s19 = scalar_lea.vmem %s1696_s4, %s1237_s21 }
   0x9   :  { %799 = vperm.xlu1 %1371, %v780_v2   ;;  %s1238_s15 = sshll.u32 %s1460_s13, 3  ;;  %v947_v5 = vld [vmem:[%s1466_s6] sm:$0xff]  ;;  %v948_v6 = vld [vmem:[%s1466_s6 + $0x8] sm:$0xff]  ;;  %v949_v8 = vld [vmem:[%s1466_s6 + $0x10] sm:$0xff]  ;;  %s158_s21 = scalar_lea.vmem %s1698_s7, %s1460_s13 }
   0xa   :  { %s133_s18 = scalar_lea.vmem %s1695_s3, %s1238_s15  ;;  %v950_v10 = vld [vmem:[%s1466_s6 + $0x18] sm:$0xff]  ;;  %v784_v11 = vld [vmem:[%s1454_s30 + $0x20] sm:$0xff]  ;;  %v952_v14 = vld [vmem:[%s1466_s6 + $0x28] sm:$0xff]  ;;  %s145_s20 = scalar_lea.vmem %s1697_s5, %s1238_s15 }
   0xb   :  { %v227_v4 = vld [vmem:[%s133_s18] sm:$0xff]  ;;  %v786_v15 = vld [vmem:[%s1454_s30 + $0x30] sm:$0xff]  ;;  %v787_v17 = vld [vmem:[%s1454_s30 + $0x38] sm:$0xff]  ;;  %s171_s26 = scalar_lea.vmem %s1699_s9, %s1460_s13 }
   0xc   :  { %1313 = vmatprep.subr.mxu0 %v227_v4  ;;  %v951_v12 = vld [vmem:[%s1466_s6 + $0x20] sm:$0xff]  ;;  %v953_v16 = vld [vmem:[%s1466_s6 + $0x30] sm:$0xff]  ;;  %v954_v19 = vld [vmem:[%s1466_s6 + $0x38] sm:$0xff]  ;;  %s1101_s11 = scalar_select %p1100_p3, 1.0, 2.0 }
   0xd   :  { %804 = vperm.xlu1 %1371, %v781_v3   ;;  %1314 = vmatpush3.msra.mxu0 %v227_v4  ;;  %v502_v18 = vld [vmem:[%s139_s19] sm:$0xff]  ;;  %v789_v21 = vld [vmem:[%s1454_s30 + $0x48] sm:$0xff]  ;;  %v790_v24 = vld [vmem:[%s1454_s30 + $0x50] sm:$0xff] }
   0xe   :  { %v788_v20 = vld [vmem:[%s1454_s30 + $0x40] sm:$0xff]  ;;  %v956_v23 = vld [vmem:[%s1466_s6 + $0x48] sm:$0xff]  ;;  %v957_v25 = vld [vmem:[%s1466_s6 + $0x50] sm:$0xff]  ;;  %s1102_s13 = smul.f32 0.020408163, %s1101_s11 }
   0xf   :  { %v503_v22 = vld [vmem:[%s145_s20] sm:$0xff]  ;;  %v791_v26 = vld [vmem:[%s1454_s30 + $0x58] sm:$0xff]  ;;  %v793_v30 = vld [vmem:[%s1454_s30 + $0x68] sm:$0xff] }
  0x10   :  { %1339 = vmatprep.subr.mxu1 %v503_v22  ;;  %v958_v27 = vld [vmem:[%s1466_s6 + $0x58] sm:$0xff]  ;;  %v792_v28 = vld [vmem:[%s1454_s30 + $0x60] sm:$0xff]  ;;  %v960_v31 = vld [vmem:[%s1466_s6 + $0x68] sm:$0xff] }
  0x11   :  { %966 = vperm.xlu1 %1371, %v947_v5   ;;  %1340 = vmatpush3.msra.mxu1 %v503_v22  ;;  %v959_v29 = vld [vmem:[%s1466_s6 + $0x60] sm:$0xff]  ;;  %v794_v32 = vld [vmem:[%s1454_s30 + $0x70] sm:$0xff]  ;;  %v795_v34 = vld [vmem:[%s1454_s30 + $0x78] sm:$0xff] }
  0x12   :  { %v961_v33 = vld [vmem:[%s1466_s6 + $0x70] sm:$0xff]  ;;  %v962_v35 = vld [vmem:[%s1466_s6 + $0x78] sm:$0xff]  ;;  %v1518_v36 = vld [vmem:[%s158_s21] ss:$0 sm:$0xff] }
  0x13   :  { %v1532_v43 = vld [vmem:[%s171_s26] ss:$0 sm:$0xff] }
  0x14   :  { %v955_v62 = vld [vmem:[%s1466_s6 + $0x40] sm:$0xff] }
  0x15   :  { %971 = vperm.xlu1 %1371, %v948_v6  }
  0x19   :  { %809 = vperm.xlu1 %1371, %v782_v7  }
  0x1d   :  { %976 = vperm.xlu1 %1371, %v949_v8  }
  0x21   :  { %814 = vperm.xlu1 %1371, %v783_v9  }
  0x25   :  { %981 = vperm.xlu1 %1371, %v950_v10  }
  0x29   :  { %819 = vperm.xlu1 %1371, %v784_v11  }
  0x2d   :  { %986 = vperm.xlu1 %1371, %v951_v12  }
  0x31   :  { %824 = vperm.xlu1 %1371, %v785_v13  }
  0x35   :  { %991 = vperm.xlu1 %1371, %v952_v14  }
  0x39   :  { %829 = vperm.xlu1 %1371, %v786_v15  }
  0x3d   :  { %996 = vperm.xlu1 %1371, %v953_v16  }
  0x41   :  { %834 = vperm.xlu1 %1371, %v787_v17  }
  0x45   :  { %504 = vxpose.xlu0.b32.start.end [1/1] (short) %v502_v18, 128  ;;  %1001 = vperm.xlu1 %1371, %v954_v19  }
  0x49   :  { %839 = vperm.xlu1 %1371, %v788_v20  }
  0x4d   :  { %844 = vperm.xlu1 %1371, %v789_v21  }
  0x51   :  { %1011 = vperm.xlu1 %1371, %v956_v23  }
  0x55   :  { %849 = vperm.xlu1 %1371, %v790_v24  }
  0x59   :  { %1016 = vperm.xlu1 %1371, %v957_v25  }
  0x5d   :  { %854 = vperm.xlu1 %1371, %v791_v26  }
  0x61   :  { %1021 = vperm.xlu1 %1371, %v958_v27  }
  0x65   :  { %859 = vperm.xlu1 %1371, %v792_v28  }
  0x69   :  { %1026 = vperm.xlu1 %1371, %v959_v29  }
  0x6d   :  { %864 = vperm.xlu1 %1371, %v793_v30  }
  0x6e   :  { %1372 = vset.pattern.permute.xlu0 %v1373_v0 }
  0x71   :  { %1031 = vperm.xlu1 %1371, %v960_v31  }
  0x75   :  { %869 = vperm.xlu1 %1371, %v794_v32  }
  0x79   :  { %1036 = vperm.xlu1 %1371, %v961_v33  }
  0x7d   :  { %874 = vperm.xlu1 %1371, %v795_v34  }
  0x81   :  { %1041 = vperm.xlu1 %1371, %v962_v35  }
  0x88   :  { %v244_v37 = vpop.trf.xlu0  ;;  %v800_v38 = vpop.permute.xlu1 %799 }
  0x89   :  { %1315 = vmatprep.mubr.msk.f32.mxu0 %vm260_vm0, %v244_v37  ;;  %v1522_v39 = vmul.f32 %v1518_v36, %v800_v38 }
  0x8c   :  { %v245_v40 = vpop.trf.xlu0  ;;  %v805_v41 = vpop.permute.xlu1 %804 }
  0x8d   :  { %1316 = vmatmul.mubr.msk.f32.vlgmr.msra.gmra.mrb[0].mxu0 %vm260_vm0, %v245_v40  ;;  %v1530_v42 = vmul.f32 %v1518_v36, %v805_v41 }
  0x90   :  { %v246_v44 = vpop.trf.xlu0  ;;  %v967_v45 = vpop.permute.xlu1 %966 }
  0x91   :  { %1318 = vmatprep.mubr.msk.f32.mxu0 %vm260_vm0, %v246_v44  ;;  %v1536_v46 = vmul.f32 %v1532_v43, %v967_v45 }
  0x94   :  { %v247_v47 = vpop.trf.xlu0  ;;  %v972_v48 = vpop.permute.xlu1 %971 }
  0x95   :  { %1319 = vmatmul.mubr.msk.f32.gmra.mrb[2].mxu0 %vm260_vm0, %v247_v47  ;;  %v1540_v49 = vmul.f32 %v1532_v43, %v972_v48 }
  0x98   :  { %v248_v50 = vpop.trf.xlu0  ;;  %v810_v51 = vpop.permute.xlu1 %809 }
  0x99   :  { %1321 = vmatprep.mubr.msk.f32.mxu0 %vm260_vm0, %v248_v50  ;;  %v1544_v52 = vmul.f32 %v1518_v36, %v810_v51 }
  0x9c   :  { %v249_v53 = vpop.trf.xlu0  ;;  %v977_v54 = vpop.permute.xlu1 %976 }
  0x9d   :  { %1322 = vmatmul.mubr.msk.f32.gmra.mrb[4].mxu0 %vm260_vm0, %v249_v53  ;;  %v1548_v55 = vmul.f32 %v1532_v43, %v977_v54 }
  0xa0   :  { %v250_v56 = vpop.trf.xlu0  ;;  %v815_v57 = vpop.permute.xlu1 %814 }
  0xa1   :  { %1324 = vmatprep.mubr.msk.f32.mxu0 %vm260_vm0, %v250_v56  ;;  %v1552_v58 = vmul.f32 %v1518_v36, %v815_v57 }
  0xa4   :  { %v251_v59 = vpop.trf.xlu0  ;;  %v982_v60 = vpop.permute.xlu1 %981 }
  0xa5   :  { %1325 = vmatmul.mubr.msk.f32.gmra.mrb[6].mxu0 %vm260_vm0, %v251_v59  ;;  %v1556_v61 = vmul.f32 %v1532_v43, %v982_v60 }
  0xa8   :  { %v252_v63 = vpop.trf.xlu0  ;;  %v1559_v0 = vpop.permute.xlu1 %819 }
  0xa9   :  { %1327 = vmatprep.mubr.msk.f32.mxu0 %vm260_vm0, %v252_v63 }
  0xaa   :  { %1006 = vperm.xlu0 %1372, %v955_v62  }
  0xac   :  { %v253_v1 = vpop.trf.xlu0  ;;  %v987_v2 = vpop.permute.xlu1 %986 }
  0xad   :  { %1328 = vmatmul.mubr.msk.f32.gmra.mrb[8].mxu0 %vm260_vm0, %v253_v1  ;;  %v1564_v3 = vmul.f32 %v1532_v43, %v987_v2  ;;  %v900_v1 = vmul.f32 8.0, %v1530_v42  ;;  %v899_v2 = vmul.f32 8.0, %v1522_v39  ;;  %v887_v39 = vmul.f32 %v1518_v36, %v1559_v0 }
  0xb0   :  { %v254_v4 = vpop.trf.xlu0  ;;  %v1566_v5 = vpop.permute.xlu1 %824 }
  0xb1   :  { %1330 = vmatprep.mubr.msk.f32.mxu0 %vm260_vm0, %v254_v4  ;;  %v888_v42 = vmul.f32 %v1518_v36, %v1566_v5 }
  0xb4   :  { %v255_v6 = vpop.trf.xlu0  ;;  %v992_v7 = vpop.permute.xlu1 %991 }
  0xb5   :  { %1331 = vmatmul.mubr.msk.f32.gmra.mrb[10].mxu0 %vm260_vm0, %v255_v6  ;;  %v1571_v8 = vmul.f32 %v1532_v43, %v992_v7 }
  0xb8   :  { %v256_v9 = vpop.trf.xlu0  ;;  %v1573_v10 = vpop.permute.xlu1 %829 }
  0xb9   :  { %1333 = vmatprep.mubr.msk.f32.mxu0 %vm260_vm0, %v256_v9 }
  0xbc   :  { %v257_v11 = vpop.trf.xlu0  ;;  %v997_v12 = vpop.permute.xlu1 %996 }
  0xbd   :  { %1334 = vmatmul.mubr.msk.f32.gmra.mrb[12].mxu0 %vm260_vm0, %v257_v11  ;;  %v1578_v13 = vmul.f32 %v1532_v43, %v997_v12 }
  0xc0   :  { %v258_v14 = vpop.trf.xlu0  ;;  %v1580_v15 = vpop.permute.xlu1 %834 }
  0xc1   :  { %1336 = vmatprep.mubr.msk.f32.mxu0 %vm260_vm0, %v258_v14 }
  0xc4   :  { %v259_v16 = vpop.trf.xlu0  ;;  %v1002_v17 = vpop.permute.xlu1 %1001 }
  0xc5   :  { %1337 = vmatmul.mubr.msk.f32.gmra.mrb[14].mxu0 %vm260_vm0, %v259_v16  ;;  %v1585_v18 = vmul.f32 %v1532_v43, %v1002_v17  ;;  %v902_v16 = vmul.f32 8.0, %v1552_v58  ;;  %v901_v17 = vmul.f32 8.0, %v1544_v52 }
  0xc8   :  { %v520_v19 = vpop.trf.xlu0  ;;  %v1587_v20 = vpop.permute.xlu1 %839 }
  0xc9   :  { %1341 = vmatprep.mubr.msk.f32.mxu1 %vm260_vm0, %v520_v19 }
  0xcc   :  { %v521_v21 = vpop.trf.xlu0  ;;  %v1590_v22 = vpop.permute.xlu1 %844 }
  0xcd   :  { %1342 = vmatmul.mubr.msk.f32.vlgmr.msra.gmra.mrb[0].mxu1 %vm260_vm0, %v521_v21 }
  0xd0   :  { %v522_v23 = vpop.trf.xlu0  ;;  %v1012_v24 = vpop.permute.xlu1 %1011 }
  0xd1   :  { %1344 = vmatprep.mubr.msk.f32.mxu1 %vm260_vm0, %v522_v23  ;;  %v1595_v25 = vmul.f32 %v1532_v43, %v1012_v24 }
  0xd4   :  { %v523_v26 = vpop.trf.xlu0  ;;  %v1597_v27 = vpop.permute.xlu1 %849 }
  0xd5   :  { %1345 = vmatmul.mubr.msk.f32.gmra.mrb[2].mxu1 %vm260_vm0, %v523_v26 }
  0xd8   :  { %v524_v28 = vpop.trf.xlu0  ;;  %v1017_v29 = vpop.permute.xlu1 %1016 }
  0xd9   :  { %1347 = vmatprep.mubr.msk.f32.mxu1 %vm260_vm0, %v524_v28  ;;  %v1602_v30 = vmul.f32 %v1532_v43, %v1017_v29 }
  0xdc   :  { %v525_v31 = vpop.trf.xlu0  ;;  %v1604_v32 = vpop.permute.xlu1 %854 }
  0xdd   :  { %1348 = vmatmul.mubr.msk.f32.gmra.mrb[4].mxu1 %vm260_vm0, %v525_v31  ;;  %v904_v31 = vmul.f32 8.0, %v888_v42 }
  0xe0   :  { %v526_v33 = vpop.trf.xlu0  ;;  %v1022_v34 = vpop.permute.xlu1 %1021 }
  0xe1   :  { %1350 = vmatprep.mubr.msk.f32.mxu1 %vm260_vm0, %v526_v33  ;;  %v1609_v35 = vmul.f32 %v1532_v43, %v1022_v34  ;;  %v903_v33 = vmul.f32 8.0, %v887_v39 }
  0xe4   :  { %v527_v37 = vpop.trf.xlu0  ;;  %v1611_v38 = vpop.permute.xlu1 %859 }
  0xe5   :  { %1351 = vmatmul.mubr.msk.f32.gmra.mrb[6].mxu1 %vm260_vm0, %v527_v37 }
  0xe8   :  { %v528_v40 = vpop.trf.xlu0  ;;  %v1027_v41 = vpop.permute.xlu1 %1026 }
  0xe9   :  { %1353 = vmatprep.mubr.msk.f32.mxu1 %vm260_vm0, %v528_v40  ;;  %v1616_v44 = vmul.f32 %v1532_v43, %v1027_v41  ;;  %v890_v41 = vmul.f32 %v1518_v36, %v1580_v15 }
  0xeb   :  { %v906_v0 = vmul.f32 8.0, %v890_v41 }
  0xec   :  { %v529_v45 = vpop.trf.xlu0  ;;  %v1618_v47 = vpop.permute.xlu1 %864 }
  0xed   :  { %1354 = vmatmul.mubr.msk.f32.gmra.mrb[8].mxu1 %vm260_vm0, %v529_v45  ;;  %v889_v45 = vmul.f32 %v1518_v36, %v1573_v10 }
  0xf0   :  { %v530_v48 = vpop.trf.xlu0  ;;  %v1032_v50 = vpop.permute.xlu1 %1031 }
  0xf1   :  { %1356 = vmatprep.mubr.msk.f32.mxu1 %vm260_vm0, %v530_v48  ;;  %v1623_v51 = vmul.f32 %v1532_v43, %v1032_v50 }
  0xf4   :  { %v531_v53 = vpop.trf.xlu0  ;;  %v1625_v54 = vpop.permute.xlu1 %869 }
  0xf5   :  { %1357 = vmatmul.mubr.msk.f32.gmra.mrb[10].mxu1 %vm260_vm0, %v531_v53  ;;  %v905_v53 = vmul.f32 8.0, %v889_v45 }
  0xf8   :  { %v532_v56 = vpop.trf.xlu0  ;;  %v1037_v57 = vpop.permute.xlu1 %1036 }
  0xf9   :  { %1359 = vmatprep.mubr.msk.f32.mxu1 %vm260_vm0, %v532_v56  ;;  %v1630_v59 = vmul.f32 %v1532_v43, %v1037_v57 }
  0xfc   :  { %v533_v60 = vpop.trf.xlu0 }
  0xfd   :  { %1360 = vmatmul.mubr.msk.f32.gmra.mrb[12].mxu1 %vm260_vm0, %v533_v60 }
 0x100   :  { %v534_v62 = vpop.trf.xlu0 }
 0x101   :  { %1362 = vmatprep.mubr.msk.f32.mxu1 %vm260_vm0, %v534_v62 }
 0x104   :  { %v535_v63 = vpop.trf.xlu0 }
 0x105   :  { %1363 = vmatmul.mubr.msk.f32.gmra.mrb[14].mxu1 %vm260_vm0, %v535_v63 }
 0x160   :  { %v1317_v4 = vpop.f32.mrb[0].mxu0 }
 0x161   :  { %v916_v6 = vsub.f32 %v1317_v4, %v900_v1  ;;  %v375_v7 = vpop.f32.mrb[1].mxu0  ;;  %v892_v1 = vmul.f32 %v1518_v36, %v1590_v22 }
 0x162   :  { %v915_v9 = vsub.f32 %v375_v7, %v899_v2  ;;  %v891_v2 = vmul.f32 %v1518_v36, %v1587_v20 }
 0x163   :  { %v1104_v11 = vmul.f32 %v916_v6, %v916_v6  ;;  %v908_v10 = vmul.f32 8.0, %v892_v1 }
 0x164   :  { %v1103_v12 = vmul.f32 %v915_v9, %v915_v9  ;;  %v907_v7 = vmul.f32 8.0, %v891_v2 }
 0x166   :  { %v1119_v14 = vadd.f32 %v1104_v11, %v1103_v12 }
 0x168   :  { %v1320_v19 = vpop.f32.mrb[2].mxu0 }
 0x169   :  { %v918_v21 = vsub.f32 %v1320_v19, %v902_v16  ;;  %v385_v23 = vpop.f32.mrb[3].mxu0  ;;  %v893_v19 = vmul.f32 %v1518_v36, %v1597_v27 }
 0x16a   :  { %v917_v24 = vsub.f32 %v385_v23, %v901_v17  ;;  %v894_v17 = vmul.f32 %v1518_v36, %v1604_v32 }
 0x16b   :  { %v1106_v28 = vmul.f32 %v918_v21, %v918_v21 }
 0x16c   :  { %v1105_v26 = vmul.f32 %v917_v24, %v917_v24  ;;  %v910_v20 = vmul.f32 8.0, %v894_v17  ;;  %v909_v24 = vmul.f32 8.0, %v893_v19  ;;  %v1069_v19 = vmul.f32 8.0, %v1556_v61 }
 0x16e   :  { %v1120_v29 = vadd.f32 %v1119_v14, %v1105_v26 }
 0x170   :  { %v1323_v34 = vpop.f32.mrb[4].mxu0  ;;  %v1121_v37 = vadd.f32 %v1120_v29, %v1106_v28 }
 0x171   :  { %v920_v58 = vsub.f32 %v1323_v34, %v904_v31  ;;  %v395_v40 = vpop.f32.mrb[5].mxu0  ;;  %v896_v31 = vmul.f32 %v1518_v36, %v1618_v47 }
 0x172   :  { %v919_v52 = vsub.f32 %v395_v40, %v903_v33  ;;  %v895_v33 = vmul.f32 %v1518_v36, %v1611_v38 }
 0x173   :  { %v1108_v48 = vmul.f32 %v920_v58, %v920_v58  ;;  %v912_v27 = vmul.f32 8.0, %v896_v31 }
 0x174   :  { %v1107_v5 = vmul.f32 %v919_v52, %v919_v52  ;;  %v911_v58 = vmul.f32 8.0, %v895_v33 }
 0x176   :  { %v1122_v50 = vadd.f32 %v1121_v37, %v1107_v5  ;;  %v875_v5 = vpop.permute.xlu1 %874 }
 0x178   :  { %v1326_v56 = vpop.f32.mrb[6].mxu0  ;;  %v1123_v57 = vadd.f32 %v1122_v50, %v1108_v48  ;;  %v898_v50 = vmul.f32 %v1518_v36, %v875_v5 }
 0x179   :  { %v922_v60 = vsub.f32 %v1326_v56, %v906_v0  ;;  %v405_v62 = vpop.f32.mrb[7].mxu0  ;;  %v897_v0 = vmul.f32 %v1518_v36, %v1625_v54 }
 0x17a   :  { %v921_v63 = vsub.f32 %v405_v62, %v905_v53  ;;  %v914_v38 = vmul.f32 8.0, %v898_v50 }
 0x17b   :  { %v1110_v4 = vmul.f32 %v922_v60, %v922_v60 }
 0x17c   :  { %v1109_v15 = vmul.f32 %v921_v63, %v921_v63 }
 0x17e   :  { %v1124_v6 = vadd.f32 %v1123_v57, %v1109_v15  ;;  %v913_v57 = vmul.f32 8.0, %v897_v0 }
 0x180   :  { %v1329_v9 = vpop.f32.mrb[8].mxu0  ;;  %v1125_v11 = vadd.f32 %v1124_v6, %v1110_v4 }
 0x181   :  { %v924_v12 = vsub.f32 %v1329_v9, %v908_v10  ;;  %v415_v14 = vpop.f32.mrb[9].mxu0  ;;  %v1067_v10 = vmul.f32 8.0, %v1540_v49 }
 0x182   :  { %v923_v16 = vsub.f32 %v415_v14, %v907_v7  ;;  %v1066_v7 = vmul.f32 8.0, %v1536_v46 }
 0x183   :  { %v1112_v21 = vmul.f32 %v924_v12, %v924_v12 }
 0x184   :  { %v1111_v22 = vmul.f32 %v923_v16, %v923_v16 }
 0x186   :  { %v1126_v23 = vadd.f32 %v1125_v11, %v1111_v22  ;;  %v1068_v22 = vmul.f32 8.0, %v1548_v55  ;;  %v1073_v55 = vmul.f32 8.0, %v1585_v18 }
 0x188   :  { %v1332_v42 = vpop.f32.mrb[10].mxu0  ;;  %v1127_v39 = vadd.f32 %v1126_v23, %v1112_v21 }
 0x189   :  { %v926_v26 = vsub.f32 %v1332_v42, %v910_v20  ;;  %v425_v28 = vpop.f32.mrb[11].mxu0 }
 0x18a   :  { %v925_v29 = vsub.f32 %v425_v28, %v909_v24 }
 0x18b   :  { %v1114_v34 = vmul.f32 %v926_v26, %v926_v26  ;;  %v1070_v26 = vmul.f32 8.0, %v1564_v3 }
 0x18c   :  { %v1113_v32 = vmul.f32 %v925_v29, %v925_v29 }
 0x18e   :  { %v1128_v37 = vadd.f32 %v1127_v39, %v1113_v32  ;;  %v1071_v39 = vmul.f32 8.0, %v1571_v8 }
 0x190   :  { %v1335_v40 = vpop.f32.mrb[12].mxu0  ;;  %v1129_v52 = vadd.f32 %v1128_v37, %v1114_v34 }
 0x191   :  { %v928_v41 = vsub.f32 %v1335_v40, %v912_v27  ;;  %v435_v45 = vpop.f32.mrb[13].mxu0  ;;  %v1007_v27 = vpop.permute.xlu0 %1006 }
 0x192   :  { %v927_v48 = vsub.f32 %v435_v45, %v911_v58  ;;  %v1072_v58 = vmul.f32 8.0, %v1578_v13  ;;  %v1058_v3 = vmul.f32 %v1532_v43, %v1007_v27 }
 0x193   :  { %v1116_v53 = vmul.f32 %v928_v41, %v928_v41 }
 0x194   :  { %v1115_v47 = vmul.f32 %v927_v48, %v927_v48  ;;  %v1074_v0 = vmul.f32 8.0, %v1058_v3 }
 0x196   :  { %v1130_v56 = vadd.f32 %v1129_v52, %v1115_v47  ;;  %v1075_v47 = vmul.f32 8.0, %v1595_v25 }
 0x198   :  { %v1338_v60 = vpop.f32.mrb[14].mxu0  ;;  %v1131_v62 = vadd.f32 %v1130_v56, %v1116_v53 }
 0x199   :  { %v930_v63 = vsub.f32 %v1338_v60, %v914_v38  ;;  %v445_v1 = vpop.f32.mrb[15].mxu0 }
 0x19a   :  { %v929_v2 = vsub.f32 %v445_v1, %v913_v57  ;;  %v1076_v1 = vmul.f32 8.0, %v1602_v30 }
 0x19b   :  { %v1118_v4 = vmul.f32 %v930_v63, %v930_v63  ;;  %v1077_v63 = vmul.f32 8.0, %v1609_v35 }
 0x19c   :  { %v1117_v15 = vmul.f32 %v929_v2, %v929_v2 }
 0x19e   :  { %v1132_v6 = vadd.f32 %v1131_v62, %v1117_v15 }
 0x1a0   :  { %v1343_v9 = vpop.f32.mrb[0].mxu1  ;;  %v1133_v11 = vadd.f32 %v1132_v6, %v1118_v4 }
 0x1a1   :  { %v1083_v36 = vsub.f32 %v1343_v9, %v1067_v10  ;;  %v650_v54 = vpop.f32.mrb[1].mxu1 }
 0x1a2   :  { %v1082_v12 = vsub.f32 %v650_v54, %v1066_v7  ;;  %1134 = vadd.xlane.f32.xlu1 %v1133_v11  ;;  %v1079_v11 = vmul.f32 8.0, %v1623_v51  ;;  %v1042_v54 = vpop.permute.xlu1 %1041 }
 0x1a3   :  { %v1144_v14 = vmul.f32 %v1083_v36, %v1083_v36  ;;  %v1078_v36 = vmul.f32 8.0, %v1616_v44  ;;  %v1065_v30 = vmul.f32 %v1532_v43, %v1042_v54 }
 0x1a4   :  { %v1143_v16 = vmul.f32 %v1082_v12, %v1082_v12 }
 0x1a6   :  { %v1159_v17 = vadd.f32 %v1144_v14, %v1143_v16 }
 0x1a8   :  { %v1346_v21 = vpop.f32.mrb[2].mxu1 }
 0x1a9   :  { %v1085_v23 = vsub.f32 %v1346_v21, %v1069_v19  ;;  %v660_v20 = vpop.f32.mrb[3].mxu1 }
 0x1aa   :  { %v1084_v24 = vsub.f32 %v660_v20, %v1068_v22  ;;  %v1080_v20 = vmul.f32 8.0, %v1630_v59 }
 0x1ab   :  { %v1146_v42 = vmul.f32 %v1085_v23, %v1085_v23  ;;  %v1081_v23 = vmul.f32 8.0, %v1065_v30 }
 0x1ac   :  { %v1145_v49 = vmul.f32 %v1084_v24, %v1084_v24 }
 0x1ae   :  { %v1160_v46 = vadd.f32 %v1159_v17, %v1145_v49 }
 0x1b0   :  { %v1349_v28 = vpop.f32.mrb[4].mxu1  ;;  %v1161_v29 = vadd.f32 %v1160_v46, %v1146_v42 }
 0x1b1   :  { %v1087_v31 = vsub.f32 %v1349_v28, %v1071_v39  ;;  %v670_v33 = vpop.f32.mrb[5].mxu1 }
 0x1b2   :  { %v1086_v32 = vsub.f32 %v670_v33, %v1070_v26 }
 0x1b3   :  { %v1148_v61 = vmul.f32 %v1087_v31, %v1087_v31 }
 0x1b4   :  { %v1147_v34 = vmul.f32 %v1086_v32, %v1086_v32 }
 0x1b6   :  { %v1162_v37 = vadd.f32 %v1161_v29, %v1147_v34  ;;  %v1374_v29 = vmov 0.0  }
 0x1b7   :  { %209 = vst [vmem:[%s1700_s10] sm:$0x1] %v1374_v29 }
 0x1b8   :  { %v1352_v40 = vpop.f32.mrb[6].mxu1  ;;  %v1163_v52 = vadd.f32 %v1162_v37, %v1148_v61 }
 0x1b9   :  { %v1089_v41 = vsub.f32 %v1352_v40, %v1073_v55  ;;  %v680_v45 = vpop.f32.mrb[7].mxu1 }
 0x1ba   :  { %v1088_v8 = vsub.f32 %v680_v45, %v1072_v58  ;;  %v1185_v45 = vlaneseq }
 0x1bb   :  { %v1150_v48 = vmul.f32 %v1089_v41, %v1089_v41 }
 0x1bc   :  { %v1149_v5 = vmul.f32 %v1088_v8, %v1088_v8  ;;  %v1186_v8 = vand.u32 127, %v1185_v45 }
 0x1be   :  { %v1164_v50 = vadd.f32 %v1163_v52, %v1149_v5  ;;  %vm1187_vm1 = vcmp.eq.s32.totalorder %v1186_v8, 0 }
 0x1c0   :  { %v1355_v53 = vpop.f32.mrb[8].mxu1  ;;  %v1165_v56 = vadd.f32 %v1164_v50, %v1150_v48 }
 0x1c1   :  { %v1091_v38 = vsub.f32 %v1355_v53, %v1075_v47  ;;  %v690_v18 = vpop.f32.mrb[9].mxu1 }
 0x1c2   :  { %v1090_v57 = vsub.f32 %v690_v18, %v1074_v0 }
 0x1c3   :  { %v1152_v13 = vmul.f32 %v1091_v38, %v1091_v38 }
 0x1c4   :  { %v1151_v60 = vmul.f32 %v1090_v57, %v1090_v57 }
 0x1c6   :  { %v1166_v62 = vadd.f32 %v1165_v56, %v1151_v60 }
 0x1c8   :  { %v1358_v2 = vpop.f32.mrb[10].mxu1  ;;  %v1167_v15 = vadd.f32 %v1166_v62, %v1152_v13 }
 0x1c9   :  { %v1093_v4 = vsub.f32 %v1358_v2, %v1077_v63  ;;  %v700_v6 = vpop.f32.mrb[11].mxu1 }
 0x1ca   :  { %v1092_v10 = vsub.f32 %v700_v6, %v1076_v1 }
 0x1cb   :  { %v1154_v9 = vmul.f32 %v1093_v4, %v1093_v4 }
 0x1cc   :  { %v1153_v7 = vmul.f32 %v1092_v10, %v1092_v10 }
 0x1ce   :  { %v1168_v25 = vadd.f32 %v1167_v15, %v1153_v7 }
 0x1d0   :  { %v1361_v12 = vpop.f32.mrb[12].mxu1  ;;  %v1169_v14 = vadd.f32 %v1168_v25, %v1154_v9 }
 0x1d1   :  { %v1095_v16 = vsub.f32 %v1361_v12, %v1079_v11  ;;  %v710_v17 = vpop.f32.mrb[13].mxu1 }
 0x1d2   :  { %v1094_v35 = vsub.f32 %v710_v17, %v1078_v36 }
 0x1d3   :  { %v1156_v22 = vmul.f32 %v1095_v16, %v1095_v16 }
 0x1d4   :  { %v1155_v19 = vmul.f32 %v1094_v35, %v1094_v35 }
 0x1d6   :  { %v1170_v21 = vadd.f32 %v1169_v14, %v1155_v19 }
 0x1d8   :  { %v1364_v24 = vpop.f32.mrb[14].mxu1  ;;  %v1171_v49 = vadd.f32 %v1170_v21, %v1156_v22 }
 0x1d9   :  { %v1097_v42 = vsub.f32 %v1364_v24, %v1081_v23  ;;  %v720_v51 = vpop.f32.mrb[15].mxu1 }
 0x1da   :  { %v1096_v46 = vsub.f32 %v720_v51, %v1080_v20 }
 0x1db   :  { %v1158_v39 = vmul.f32 %v1097_v42, %v1097_v42 }
 0x1dc   :  { %v1157_v44 = vmul.f32 %v1096_v46, %v1096_v46 }
 0x1de   :  { %v1172_v26 = vadd.f32 %v1171_v49, %v1157_v44 }
 0x1e0   :  { %v1173_v28 = vadd.f32 %v1172_v26, %v1158_v39 }
 0x1e2   :  { %1174 = vadd.xlane.f32.xlu1 %v1173_v28 }
 0x22f   :  { %v1135_v43 = vpop.xlane.xlu1 %1134 }
 0x230   :  { %v1136_v31 = vrot.slane %v1135_v43, 4 }
 0x232   :  { %v1137_v33 = vadd.f32 %v1136_v31, %v1135_v43 }
 0x234   :  { %v1138_v32 = vrot.slane %v1137_v33, 2 }
 0x236   :  { %v1139_v59 = vadd.f32 %v1138_v32, %v1137_v33 }
 0x238   :  { %v1140_v34 = vrot.slane %v1139_v59, 1 }
 0x23a   :  { %v1141_v61 = vadd.f32 %v1140_v34, %v1139_v59 }
 0x23c   :  { %1365 = vpush %v1141_v61 }
 0x26d   :  { %s1366_s12 = spop %1365 }
 0x26f   :  { %v1175_v37 = vpop.xlane.xlu1 %1174 }
 0x270   :  { %v1176_v55 = vrot.slane %v1175_v37, 4 }
 0x272   :  { %v1177_v27 = vadd.f32 %v1176_v55, %v1175_v37 }
 0x274   :  { %v1178_v58 = vrot.slane %v1177_v27, 2 }
 0x276   :  { %v1179_v40 = vadd.f32 %v1178_v58, %v1177_v27 }
 0x278   :  { %v1180_v52 = vrot.slane %v1179_v40, 1 }
 0x27a   :  { %v1181_v41 = vadd.f32 %v1180_v52, %v1179_v40 }
 0x27c   :  { %1367 = vpush %v1181_v41 }
 0x2ad   :  { %s1368_s2 = spop %1367 }
 0x2ae   :  { %s1183_s14 = sadd.f32 %s1368_s2, %s1366_s12 }
 0x2b0   :  { %s1184_s6 = smul.f32 %s1183_s14, %s1102_s13 }
 0x2b2   :  { %v1188_v3 = vstv %s1184_s6 }
 0x2b3   :  { %v1189_v5 = vsel %vm1187_vm1, %v1188_v3, 0.0 }
 0x2b4   :  { %1190 = vst [vmem:[%s1700_s10] sm:$0x1] %v1189_v5 }

</bundles_post_ra>
